<compile_context>
chip_gen: v7x
topology: tpu7x:2x2x1
jax: 0.10.0
libtpu: 0.0.40
codegen_flags: <defaults>
</compile_context>

<pallas_src>
import functools

import jax
import jax.numpy as jnp
from jax.experimental import pallas as pl
from jax.experimental.pallas import tpu as pltpu

LANE = 128
SUBLANE = 8
_NEG_BIG = -1e30  # bias for padded action columns (exp underflows to exactly 0)


def _round_up(x, m):
    return (x + m - 1) // m * m


def _device_kind():
    try:
        return jax.devices()[0].device_kind.lower()
    except Exception:
        return ""


def _actor_kernel(x_ref, w1_ref, b1_ref, w2_ref, b2_ref, w3_ref, b3_ref, o_ref,
                  *, exp_dtype):
    """Fused MLP: (Linear+ReLU) x2 -> Linear -> softmax for one batch tile."""
    # x tile arrives f32 and only 8 lanes wide; cast to bf16 for the MXU.
    x = x_ref[...].astype(w1_ref.dtype)

    # fc1 + ReLU (bf16 MXU operands, f32 accumulate / elementwise)
    h1 = jnp.dot(x, w1_ref[...], preferred_element_type=jnp.float32) + b1_ref[...]
    h1 = jnp.maximum(h1, 0.0)

    # fc2 + ReLU
    h2 = jnp.dot(h1.astype(w2_ref.dtype), w2_ref[...],
                 preferred_element_type=jnp.float32) + b2_ref[...]
    h2 = jnp.maximum(h2, 0.0)

    # fc_out: padded action columns carry a -1e30 bias (added in f32 after the
    # f32 accumulate) -> they are exactly masked out of the softmax.
    logits = jnp.dot(h2.astype(w3_ref.dtype), w3_ref[...],
                     preferred_element_type=jnp.float32) + b3_ref[...]

    # numerically-stable softmax over the (padded, lane-dense) action axis.
    m = jnp.max(logits, axis=-1, keepdims=True)
    # exp in bf16 on v6e/v7x (bf16 EUP), f32 on v5e; accumulate/divide in f32.
    e = jnp.exp((logits - m).astype(exp_dtype)).astype(jnp.float32)
    denom = jnp.sum(e, axis=-1, keepdims=True)
    # Exact divide (NOT pl.reciprocal(approx=True)): rows sum to 1 within f32
    # rounding, which downstream categorical sampling / log-prob math needs.
    o_ref[...] = (e / denom).astype(o_ref.dtype)


def init_actor_params(key, state_dim, action_dim, hidden_dim=64):
    """Deterministic init mimicking nn.Linear's U(-1/sqrt(fan_in), 1/sqrt(fan_in)).

    Weights are returned already transposed to [in_features, out_features].
    """
    def linear(k, fan_in, fan_out):
        kw, kb = jax.random.split(k)
        bound = 1.0 / jnp.sqrt(jnp.float32(fan_in))
        w = jax.random.uniform(kw, (fan_in, fan_out), jnp.float32, -bound, bound)
        b = jax.random.uniform(kb, (1, fan_out), jnp.float32, -bound, bound)
        return w, b

    k1, k2, k3 = jax.random.split(key, 3)
    w1, b1 = linear(k1, state_dim, hidden_dim)
    w2, b2 = linear(k2, hidden_dim, hidden_dim)
    w3, b3 = linear(k3, hidden_dim, action_dim)
    return w1, b1, w2, b2, w3, b3


def prepare_actor_params(w1, b1, w2, b2, w3, b3):
    """Pad/cast parameters ONCE (at init / after weight updates, not per step)."""
    state_dim, hidden_dim = w1.shape
    action_dim = w3.shape[1]

    sd_p = _round_up(state_dim, SUBLANE)   # contraction dim only needs 8 sublanes
    h_p = _round_up(hidden_dim, LANE)
    ad_p = _round_up(action_dim, LANE)

    w1_p = jnp.zeros((sd_p, h_p), jnp.bfloat16).at[:state_dim, :hidden_dim].set(
        w1.astype(jnp.bfloat16))
    b1_p = jnp.zeros((1, h_p), jnp.float32).at[:, :hidden_dim].set(
        jnp.asarray(b1, jnp.float32).reshape(1, hidden_dim))
    w2_p = jnp.zeros((h_p, h_p), jnp.bfloat16).at[:hidden_dim, :hidden_dim].set(
        w2.astype(jnp.bfloat16))
    b2_p = jnp.zeros((1, h_p), jnp.float32).at[:, :hidden_dim].set(
        jnp.asarray(b2, jnp.float32).reshape(1, hidden_dim))
    w3_p = jnp.zeros((h_p, ad_p), jnp.bfloat16).at[:hidden_dim, :action_dim].set(
        w3.astype(jnp.bfloat16))
    # padded action columns get a huge negative bias -> softmax-exact masking
    b3_p = jnp.full((1, ad_p), _NEG_BIG, jnp.float32).at[:, :action_dim].set(
        jnp.asarray(b3, jnp.float32).reshape(1, action_dim))
    return w1_p, b1_p, w2_p, b2_p, w3_p, b3_p


@functools.partial(jax.jit, static_argnames=("action_dim", "block_batch"))
def actor_forward(state, w1_p, b1_p, w2_p, b2_p, w3_p, b3_p, *,
                  action_dim, block_batch=512):
    """state: [B, state_dim] float32 -> action_probs: [B, action_dim] float32.

    Takes pre-padded parameters from prepare_actor_params().
    """
    batch, state_dim = state.shape
    sd_p, h_p = w1_p.shape
    ad_p = w3_p.shape[1]

    # batch tiling: big tiles amortize the ~0.35us/step overhead; multiple of 16
    tb = min(block_batch, _round_up(batch, 16))
    b_p = _round_up(batch, tb)
    grid_tiles = b_p // tb

    # only the state needs per-call padding: f32, 8 lanes wide (full-array last
    # dim, so the (8,128) block rule is satisfied with an 8-wide block).
    x_p = jnp.zeros((b_p, sd_p), jnp.float32).at[:batch, :state_dim].set(
        state.astype(jnp.float32))

    kind = _device_kind()
    # v5e has no bf16 EUP -> keep exp in f32 there; bf16 exp on v6e/v7x.
    exp_dtype = jnp.float32 if "v5" in kind else jnp.bfloat16
    # v7x: plain "parallel" doesn't split work over the 2 TensorCores; use
    # CORE_PARALLEL when there are >=2 (even) batch tiles so both TCs are busy.
    if "v7" in kind and grid_tiles >= 2 and grid_tiles % 2 == 0:
        dims = (pltpu.CORE_PARALLEL,)
    else:
        dims = ("parallel",)

    const = lambda i: (0, 0)  # weights/biases: same (resident) block every step

    out = pl.pallas_call(
        functools.partial(_actor_kernel, exp_dtype=exp_dtype),
        # kept f32: probabilities usually feed sampling / log-prob math; switch
        # to bf16 here (and in the store) to halve the dominant HBM write if OK.
        out_shape=jax.ShapeDtypeStruct((b_p, ad_p), jnp.float32),
        grid=(grid_tiles,),
        in_specs=[
            pl.BlockSpec((tb, sd_p), lambda i: (i, 0)),   # state tile (f32, 8 lanes)
            pl.BlockSpec((sd_p, h_p), const),             # w1 (resident)
            pl.BlockSpec((1, h_p), const),                # b1
            pl.BlockSpec((h_p, h_p), const),              # w2
            pl.BlockSpec((1, h_p), const),                # b2
            pl.BlockSpec((h_p, ad_p), const),             # w3
            pl.BlockSpec((1, ad_p), const),               # b3
        ],
        out_specs=pl.BlockSpec((tb, ad_p), lambda i: (i, 0)),
        compiler_params=pltpu.CompilerParams(dimension_semantics=dims),
    )(x_p, w1_p, b1_p, w2_p, b2_p, w3_p, b3_p)

    return out[:batch, :action_dim]


def _reference_forward(state, w1, b1, w2, b2, w3, b3):
    """Pure-JAX f32 reference (matches the PyTorch module)."""
    h1 = jnp.maximum(state @ w1 + b1, 0.0)
    h2 = jnp.maximum(h1 @ w2 + b2, 0.0)
    return jax.nn.softmax(h2 @ w3 + b3, axis=-1)


if __name__ == "__main__":
    # state_nvec of length 6 -> state_dim = 6; discrete action_dim = 5
    batch, state_dim, action_dim, hidden_dim = 8, 6, 5, 64

    key = jax.random.PRNGKey(0)
    k_params, k_state = jax.random.split(key)

    raw_params = init_actor_params(k_params, state_dim, action_dim, hidden_dim)
    padded_params = prepare_actor_params(*raw_params)   # once, at init time

    # MultiDiscrete states are integer-valued; cast to float32 as the net expects.
    state = jax.random.randint(k_state, (batch, state_dim), 0, 10).astype(jnp.float32)

    probs = actor_forward(state, *padded_params, action_dim=action_dim)
    probs = jax.block_until_ready(probs)

    # sanity: rows are valid probability distributions (exact divide -> tight tol)
    assert probs.shape == (batch, action_dim)
    row_sums = jnp.sum(probs, axis=-1)
    assert bool(jnp.all(jnp.abs(row_sums - 1.0) < 1e-3)), row_sums
    assert bool(jnp.all(probs >= 0.0))

    # numerics vs f32 reference (bf16 matmul operands -> loose tolerance)
    expected = _reference_forward(state, *raw_params)
    assert bool(jnp.max(jnp.abs(probs - expected)) < 5e-2)

    print("KERNEL_OK")
</pallas_src>

<mosaic_0001>
module attributes {stable_mosaic.version = 11 : i64} {
  func.func @_actor_kernel(%arg0: i32, %arg1: memref<16x8xf32, #tpu.memory_space<vmem>>, %arg2: memref<8x128xbf16, #tpu.memory_space<vmem>>, %arg3: memref<1x128xf32, #tpu.memory_space<vmem>>, %arg4: memref<128x128xbf16, #tpu.memory_space<vmem>>, %arg5: memref<1x128xf32, #tpu.memory_space<vmem>>, %arg6: memref<128x128xbf16, #tpu.memory_space<vmem>>, %arg7: memref<1x128xf32, #tpu.memory_space<vmem>>, %arg8: memref<16x128xf32, #tpu.memory_space<vmem>>) attributes {dimension_semantics = [#tpu.dimension_semantics<parallel>], iteration_bounds = array<i64: 1>, scalar_prefetch = 0 : i64, scratch_operands = 0 : i64, tpu.core_type = #tpu.core_type<tc>, window_params = [{transform_indices = @transform_0, window_bounds = array<i64: 16, 8>}, {pipeline_mode = #tpu.pipeline_mode<synchronous>, transform_indices = @transform_1, window_bounds = array<i64: 8, 128>}, {pipeline_mode = #tpu.pipeline_mode<synchronous>, transform_indices = @transform_2, window_bounds = array<i64: 1, 128>}, {pipeline_mode = #tpu.pipeline_mode<synchronous>, transform_indices = @transform_3, window_bounds = array<i64: 128, 128>}, {pipeline_mode = #tpu.pipeline_mode<synchronous>, transform_indices = @transform_4, window_bounds = array<i64: 1, 128>}, {pipeline_mode = #tpu.pipeline_mode<synchronous>, transform_indices = @transform_5, window_bounds = array<i64: 128, 128>}, {pipeline_mode = #tpu.pipeline_mode<synchronous>, transform_indices = @transform_6, window_bounds = array<i64: 1, 128>}, {transform_indices = @transform_7, window_bounds = array<i64: 16, 128>}]} {
    %c0 = arith.constant 0 : index
    %c0_0 = arith.constant 0 : index
    %0 = vector.load %arg1[%c0, %c0_0] : memref<16x8xf32, #tpu.memory_space<vmem>>, vector<16x8xf32>
    %1 = arith.truncf %0 : vector<16x8xf32> to vector<16x8xbf16>
    %c0_1 = arith.constant 0 : index
    %c0_2 = arith.constant 0 : index
    %2 = vector.load %arg2[%c0_1, %c0_2] : memref<8x128xbf16, #tpu.memory_space<vmem>>, vector<8x128xbf16>
    %cst = arith.constant dense<0.000000e+00> : vector<16x128xf32>
    %3 = tpu.matmul %1, %2, %cst {dimension_numbers = #tpu.dot_dimension_numbers<[1], [0], [0], [1], [0, 0, 1, 1], [], []>} : vector<16x8xbf16>, vector<8x128xbf16>, vector<16x128xf32> -> vector<16x128xf32>
    %c0_3 = arith.constant 0 : index
    %c0_4 = arith.constant 0 : index
    %4 = vector.load %arg3[%c0_3, %c0_4] : memref<1x128xf32, #tpu.memory_space<vmem>>, vector<1x128xf32>
    %5 = vector.broadcast %4 : vector<1x128xf32> to vector<16x128xf32>
    %6 = arith.addf %3, %5 : vector<16x128xf32>
    %cst_5 = arith.constant 0.000000e+00 : f32
    %7 = vector.broadcast %cst_5 : f32 to vector<16x128xf32>
    %8 = arith.maximumf %6, %7 : vector<16x128xf32>
    %9 = arith.truncf %8 : vector<16x128xf32> to vector<16x128xbf16>
    %c0_6 = arith.constant 0 : index
    %c0_7 = arith.constant 0 : index
    %10 = vector.load %arg4[%c0_6, %c0_7] : memref<128x128xbf16, #tpu.memory_space<vmem>>, vector<128x128xbf16>
    %cst_8 = arith.constant dense<0.000000e+00> : vector<16x128xf32>
    %11 = tpu.matmul %9, %10, %cst_8 {dimension_numbers = #tpu.dot_dimension_numbers<[1], [0], [0], [1], [0, 0, 1, 1], [], []>} : vector<16x128xbf16>, vector<128x128xbf16>, vector<16x128xf32> -> vector<16x128xf32>
    %c0_9 = arith.constant 0 : index
    %c0_10 = arith.constant 0 : index
    %12 = vector.load %arg5[%c0_9, %c0_10] : memref<1x128xf32, #tpu.memory_space<vmem>>, vector<1x128xf32>
    %13 = vector.broadcast %12 : vector<1x128xf32> to vector<16x128xf32>
    %14 = arith.addf %11, %13 : vector<16x128xf32>
    %cst_11 = arith.constant 0.000000e+00 : f32
    %15 = vector.broadcast %cst_11 : f32 to vector<16x128xf32>
    %16 = arith.maximumf %14, %15 : vector<16x128xf32>
    %17 = arith.truncf %16 : vector<16x128xf32> to vector<16x128xbf16>
    %c0_12 = arith.constant 0 : index
    %c0_13 = arith.constant 0 : index
    %18 = vector.load %arg6[%c0_12, %c0_13] : memref<128x128xbf16, #tpu.memory_space<vmem>>, vector<128x128xbf16>
    %cst_14 = arith.constant dense<0.000000e+00> : vector<16x128xf32>
    %19 = tpu.matmul %17, %18, %cst_14 {dimension_numbers = #tpu.dot_dimension_numbers<[1], [0], [0], [1], [0, 0, 1, 1], [], []>} : vector<16x128xbf16>, vector<128x128xbf16>, vector<16x128xf32> -> vector<16x128xf32>
    %c0_15 = arith.constant 0 : index
    %c0_16 = arith.constant 0 : index
    %20 = vector.load %arg7[%c0_15, %c0_16] : memref<1x128xf32, #tpu.memory_space<vmem>>, vector<1x128xf32>
    %21 = vector.broadcast %20 : vector<1x128xf32> to vector<16x128xf32>
    %22 = arith.addf %19, %21 : vector<16x128xf32>
    %cst_17 = arith.constant dense<0xFF800000> : vector<16xf32>
    %23 = vector.multi_reduction <maximumf>, %22, %cst_17 [1] : vector<16x128xf32> to vector<16xf32>
    %24 = vector.shape_cast %23 : vector<16xf32> to vector<16x1xf32>
    %25 = vector.broadcast %24 : vector<16x1xf32> to vector<16x128xf32>
    %26 = arith.subf %22, %25 : vector<16x128xf32>
    %27 = arith.truncf %26 : vector<16x128xf32> to vector<16x128xbf16>
    %28 = math.exp %27 : vector<16x128xbf16>
    %29 = arith.extf %28 : vector<16x128xbf16> to vector<16x128xf32>
    %cst_18 = arith.constant dense<0.000000e+00> : vector<16xf32>
    %30 = vector.multi_reduction <add>, %29, %cst_18 [1] : vector<16x128xf32> to vector<16xf32>
    %31 = vector.shape_cast %30 : vector<16xf32> to vector<16x1xf32>
    %32 = vector.broadcast %31 : vector<16x1xf32> to vector<16x128xf32>
    %33 = arith.divf %29, %32 : vector<16x128xf32>
    %c0_19 = arith.constant 0 : index
    %c0_20 = arith.constant 0 : index
    %34 = vector.load %arg8[%c0_19, %c0_20] : memref<16x128xf32, #tpu.memory_space<vmem>>, vector<16x128xf32>
    tpu.vector_store %arg8[%c0_19, %c0_20], %33 {strides = array<i32>} : memref<16x128xf32, #tpu.memory_space<vmem>>, vector<16x128xf32>,
    return
  }
  func.func @transform_0(%arg0: i32) -> (i32, i32) {
    %c0_i32 = arith.constant 0 : i32
    %c0_i32_0 = arith.constant 0 : i32
    return %arg0, %c0_i32 : i32, i32
  }
  func.func @transform_1(%arg0: i32) -> (i32, i32) {
    %c0_i32 = arith.constant 0 : i32
    %c0_i32_0 = arith.constant 0 : i32
    %c0_i32_1 = arith.constant 0 : i32
    return %c0_i32, %c0_i32_0 : i32, i32
  }
  func.func @transform_2(%arg0: i32) -> (i32, i32) {
    %c0_i32 = arith.constant 0 : i32
    %c0_i32_0 = arith.constant 0 : i32
    %c0_i32_1 = arith.constant 0 : i32
    return %c0_i32, %c0_i32_0 : i32, i32
  }
  func.func @transform_3(%arg0: i32) -> (i32, i32) {
    %c0_i32 = arith.constant 0 : i32
    %c0_i32_0 = arith.constant 0 : i32
    %c0_i32_1 = arith.constant 0 : i32
    return %c0_i32, %c0_i32_0 : i32, i32
  }
  func.func @transform_4(%arg0: i32) -> (i32, i32) {
    %c0_i32 = arith.constant 0 : i32
    %c0_i32_0 = arith.constant 0 : i32
    %c0_i32_1 = arith.constant 0 : i32
    return %c0_i32, %c0_i32_0 : i32, i32
  }
  func.func @transform_5(%arg0: i32) -> (i32, i32) {
    %c0_i32 = arith.constant 0 : i32
    %c0_i32_0 = arith.constant 0 : i32
    %c0_i32_1 = arith.constant 0 : i32
    return %c0_i32, %c0_i32_0 : i32, i32
  }
  func.func @transform_6(%arg0: i32) -> (i32, i32) {
    %c0_i32 = arith.constant 0 : i32
    %c0_i32_0 = arith.constant 0 : i32
    %c0_i32_1 = arith.constant 0 : i32
    return %c0_i32, %c0_i32_0 : i32, i32
  }
  func.func @transform_7(%arg0: i32) -> (i32, i32) {
    %c0_i32 = arith.constant 0 : i32
    %c0_i32_0 = arith.constant 0 : i32
    return %arg0, %c0_i32 : i32, i32
  }
}

</mosaic_0001>

<bundles_post_ra>
// kernel: actor_forward.1
= control target key start
LH: loop header
LB: loop body
LE: loop exit
PB: predicated region body
PF: predicated region fallthrough
CT: control target
= control target key end

     0   :  { %12 = vsyncpa [#allocation3], 0  ;;  %s652_s0 = inlined_call_operand.vmem [shape: f32[16,8], index: 0, kind: input, shape index: {}]   ;;  %s653_s1 = inlined_call_operand.vmem [shape: bf16[8,128], index: 1, kind: input, shape index: {}]   ;;  %s654_s2 = inlined_call_operand.vmem [shape: f32[1,128], index: 2, kind: input, shape index: {}]   ;;  %s655_s3 = inlined_call_operand.hbm [shape: bf16[128,128], index: 3, kind: input, shape index: {}]   ;;  %s656_s4 = inlined_call_operand.vmem [shape: f32[1,128], index: 4, kind: input, shape index: {}]   ;;  %s657_s5 = inlined_call_operand.hbm [shape: bf16[128,128], index: 5, kind: input, shape index: {}]   ;;  %s658_s6 = inlined_call_operand.vmem [shape: f32[1,128], index: 6, kind: input, shape index: {}]   ;;  %s659_s7 = inlined_call_operand.vmem [shape: f32[16,128], index: 7, kind: output, shape index: {}]  }
   0x1   :  { %13 = vsyncpa [#allocation5], 0  ;;  %s535_s24 = smov [#allocation2]   ;;  %s487_s28 = scalar_lea.hbm %s655_s3, 1024 }
   0x2   :  { %s25_s25 = sshll.u32 %s535_s24, 4  ;;  %p488_p0 = scmp.ne.s32.totalorder %s655_s3, %s487_s28  ;;  %s26_s25 = int_to_ptr.vmem [resolvable:$true] %s25_s25 }
   0x3   :  { %p491_p1 = scmp.lt.u32.totalorder %s487_s28, %s655_s3 }
   0x5   :  { %p493_p2 = pnand %p491_p1, %p488_p0 }
   0x7   :  { %496 = shalt.err (!%p493_p2)
}
   0x8   :  { %s497_s10 = scalar_lea.vmem %s26_s25, 1024  ;;  %p502_p4 = scmp.lt.s32.totalorder %s26_s25, %s26_s25 }
   0x9   :  { %p498_p3 = scmp.ne.s32.totalorder %s26_s25, %s497_s10  ;;  %p503_p5 = scmp.lt.s32.totalorder %s497_s10, %s497_s10 }
   0xb   :  { %p504_p6 = por %p503_p5, %p502_p4 }
   0xd   :  { %p505_p7 = pnand %p504_p6, %p498_p3 }
   0xf   :  { %508 = shalt.err (!%p505_p7)
}
  0x10   :  { %s536_s11 = smov 64   ;;  %s537_s12 = smov 4  }
  0x11   :  { %31 = dma.hbm_to_vmem [thread:$0]  %s655_s3, 1024, %s26_s25, [#allocation3], %s536_s11, %s536_s11, %s537_s12  }
  0x12   :  { %s538_s15 = smov [#allocation4]   ;;  %s509_s19 = scalar_lea.hbm %s657_s5, 1024 }
  0x13   :  { %s39_s16 = sshll.u32 %s538_s15, 4  ;;  %p510_p8 = scmp.ne.s32.totalorder %s657_s5, %s509_s19  ;;  %s40_s16 = int_to_ptr.vmem [resolvable:$true] %s39_s16 }
  0x14   :  { %p513_p9 = scmp.lt.u32.totalorder %s509_s19, %s657_s5 }
  0x16   :  { %p515_p10 = pnand %p513_p9, %p510_p8 }
  0x18   :  { %518 = shalt.err (!%p515_p10)
}
  0x19   :  { %s519_s24 = scalar_lea.vmem %s40_s16, 1024  ;;  %p524_p12 = scmp.lt.s32.totalorder %s40_s16, %s40_s16 }
  0x1a   :  { %p520_p11 = scmp.ne.s32.totalorder %s40_s16, %s519_s24  ;;  %p525_p13 = scmp.lt.s32.totalorder %s519_s24, %s519_s24 }
  0x1c   :  { %p526_p0 = por %p525_p13, %p524_p12 }
  0x1e   :  { %p527_p1 = pnand %p526_p0, %p520_p11 }
  0x20   :  { %530 = shalt.err (!%p527_p1)
}
  0x21   :  { %45 = dma.hbm_to_vmem [thread:$0]  %s657_s5, 1024, %s40_s16, [#allocation5], %s536_s11, %s536_s11, %s537_s12  }
  0x22   :  { %531 = dma.done.wait [#allocation3], 1024  }
  0x23   :  { %532 = vsyncadd [#allocation3], 4294966272 }
  0x24   :  { %533 = dma.done.wait [#allocation5], 1024  }
  0x25   :  { %534 = vsyncadd [#allocation5], 4294966272  ;;  %v539_v0 = vmov 0.0   ;;  %vm540_vm0 = vmmov 0   ;;  %vm70_vm1 = vcmask 1043456   ;;  %v55_v2 = vld [vmem:[%s652_s0] sm:$0xff] }
  0x26   :  { %413 = vmatprep.subr.bf16.mxu0 %v539_v0  ;;  %415 = vmatprep.mubr.msk.bf16.mxu0 %vm540_vm0, %v539_v0  ;;  %v58_v1 = vld [vmem:[%s653_s1] sm:$0xf]  ;;  %v56_v3 = vld [vmem:[%s652_s0 + $0x8] sm:$0xff]  ;;  %vm66_vm2 = vcmask 64512   ;;  %v467_v8 = vld [vmem:[#allocation2 + $0x10] sm:$0xff]  }
  0x27   :  { %419 = vmatprep.subr.bf16.mxu1 %v539_v0  ;;  %435 = vmatprep.mubr.msk.bf16.mxu1 %vm540_vm0, %v539_v0  ;;  %v72_v4 = vsel %vm70_vm1, %v58_v1, 0  ;;  %v57_v5 = vpack.c.bf16 %v56_v3, %v55_v2  ;;  %v465_v6 = vld [vmem:[#allocation2] sm:$0xff]   ;;  %v466_v7 = vld [vmem:[#allocation2 + $0x8] sm:$0xff]   ;;  %v468_v9 = vld [vmem:[#allocation2 + $0x18] sm:$0xff]  }
  0x28   :  { %414 = vmatpush3.bf16.msra.mxu0 %v72_v4  ;;  %420 = vmatpush3.bf16.msra.mxu1 %v465_v6  ;;  %v469_v10 = vld [vmem:[#allocation2 + $0x20] sm:$0xff]   ;;  %v470_v11 = vld [vmem:[#allocation2 + $0x28] sm:$0xff]   ;;  %v471_v12 = vld [vmem:[#allocation2 + $0x30] sm:$0xff]  }
  0x29   :  { %439 = vmatprep.subr.bf16.mxu0 %v539_v0  ;;  %421 = vmatprep.subr.bf16.mxu1 %v539_v0  ;;  %v472_v13 = vld [vmem:[#allocation2 + $0x38] sm:$0xff]   ;;  %v473_v14 = vld [vmem:[#allocation4] sm:$0xff]   ;;  %v474_v15 = vld [vmem:[#allocation4 + $0x8] sm:$0xff]  }
  0x2a   :  { %v475_v16 = vld [vmem:[#allocation4 + $0x10] sm:$0xff]   ;;  %v476_v17 = vld [vmem:[#allocation4 + $0x18] sm:$0xff]   ;;  %v477_v18 = vld [vmem:[#allocation4 + $0x20] sm:$0xff]  }
  0x2b   :  { %416 = vmatmul.mubr.msk.bf16.vlgmr.msra.gmra.mrb[0].mxu0 %vm66_vm2, %v57_v5  ;;  %v478_v19 = vld [vmem:[#allocation4 + $0x28] sm:$0xff]   ;;  %v373_v20 = vld [vmem:[%s654_s2] ss:$0 sm:$0xff]  ;;  %v479_v30 = vld [vmem:[#allocation4 + $0x30] sm:$0xff]  }
  0x2c   :  { %455 = vmatprep.mubr.msk.bf16.mxu0 %vm540_vm0, %v539_v0  ;;  %422 = vmatpush3.bf16.msra.mxu1 %v466_v7  ;;  %v480_v31 = vld [vmem:[#allocation4 + $0x38] sm:$0xff]   ;;  %v375_v32 = vld [vmem:[%s656_s4] ss:$0 sm:$0xff] }
  0x2d   :  { %423 = vmatprep.subr.bf16.mxu1 %v539_v0  ;;  %440 = vmatpush3.bf16.msra.mxu0 %v473_v14  ;;  %v384_v42 = vld [vmem:[%s658_s6] ss:$0 sm:$0xff] }
  0x2e   :  { %441 = vmatprep.subr.bf16.mxu0 %v539_v0 }
  0x30   :  { %424 = vmatpush3.bf16.msra.mxu1 %v467_v8 }
  0x31   :  { %425 = vmatprep.subr.bf16.mxu1 %v539_v0  ;;  %442 = vmatpush3.bf16.msra.mxu0 %v474_v15 }
  0x32   :  { %443 = vmatprep.subr.bf16.mxu0 %v539_v0 }
  0x34   :  { %426 = vmatpush3.bf16.msra.mxu1 %v468_v9 }
  0x35   :  { %427 = vmatprep.subr.bf16.mxu1 %v539_v0  ;;  %444 = vmatpush3.bf16.msra.mxu0 %v475_v16 }
  0x36   :  { %445 = vmatprep.subr.bf16.mxu0 %v539_v0 }
  0x38   :  { %428 = vmatpush3.bf16.msra.mxu1 %v469_v10 }
  0x39   :  { %429 = vmatprep.subr.bf16.mxu1 %v539_v0  ;;  %446 = vmatpush3.bf16.msra.mxu0 %v476_v17 }
  0x3a   :  { %447 = vmatprep.subr.bf16.mxu0 %v539_v0 }
  0x3c   :  { %430 = vmatpush3.bf16.msra.mxu1 %v470_v11 }
  0x3d   :  { %431 = vmatprep.subr.bf16.mxu1 %v539_v0  ;;  %448 = vmatpush3.bf16.msra.mxu0 %v477_v18 }
  0x3e   :  { %449 = vmatprep.subr.bf16.mxu0 %v539_v0 }
  0x40   :  { %432 = vmatpush3.bf16.msra.mxu1 %v471_v12 }
  0x41   :  { %433 = vmatprep.subr.bf16.mxu1 %v539_v0  ;;  %450 = vmatpush3.bf16.msra.mxu0 %v478_v19 }
  0x42   :  { %451 = vmatprep.subr.bf16.mxu0 %v539_v0 }
  0x44   :  { %434 = vmatpush3.bf16.msra.mxu1 %v472_v13 }
  0x45   :  { %452 = vmatpush3.bf16.msra.mxu0 %v479_v30 }
  0x46   :  { %453 = vmatprep.subr.bf16.mxu0 %v539_v0 }
  0x49   :  { %454 = vmatpush3.bf16.msra.mxu0 %v480_v31 }
  0xfe   :  { %v108_v21 = vpop.f32.mrb[0].mxu0 }
  0xff   :  { %v109_v22 = vadd.f32 %v373_v20, %v108_v21  ;;  %v417_v23 = vpop.f32.mrb[1].mxu0 }
 0x100   :  { %v111_v24 = vpop.f32.mrb[2].mxu0 }
 0x101   :  { %v112_v25 = vadd.f32 %v373_v20, %v111_v24  ;;  %v418_v26 = vpop.f32.mrb[3].mxu0  ;;  %v115_v27 = vmax.f32 %v109_v22, 0.0 }
 0x103   :  { %v116_v28 = vmax.f32 %v112_v25, 0.0 }
 0x105   :  { %v117_v29 = vpack.c.bf16 %v116_v28, %v115_v27 }
 0x107   :  { %436 = vmatmul.mubr.bf16.vlgmr.msra.gmra.mrb[0].mxu1 %v117_v29 }
 0x1da   :  { %v223_v33 = vpop.f32.mrb[0].mxu1 }
 0x1db   :  { %v224_v34 = vadd.f32 %v375_v32, %v223_v33  ;;  %v437_v35 = vpop.f32.mrb[1].mxu1 }
 0x1dc   :  { %v226_v36 = vpop.f32.mrb[2].mxu1 }
 0x1dd   :  { %v227_v37 = vadd.f32 %v375_v32, %v226_v36  ;;  %v438_v38 = vpop.f32.mrb[3].mxu1  ;;  %v230_v39 = vmax.f32 %v224_v34, 0.0 }
 0x1df   :  { %v231_v40 = vmax.f32 %v227_v37, 0.0 }
 0x1e1   :  { %v232_v41 = vpack.c.bf16 %v231_v40, %v230_v39 }
 0x1e3   :  { %456 = vmatmul.mubr.bf16.vlgmr.msra.gmra.mrb[4].mxu0 %v232_v41 }
 0x2b6   :  { %v338_v43 = vpop.f32.mrb[4].mxu0 }
 0x2b7   :  { %v339_v44 = vadd.f32 %v384_v42, %v338_v43  ;;  %v457_v45 = vpop.f32.mrb[5].mxu0 }
 0x2b8   :  { %v341_v46 = vpop.f32.mrb[6].mxu0 }
 0x2b9   :  { %345 = vmax.xlane.f32.xlu0 %v339_v44  ;;  %v458_v47 = vpop.f32.mrb[7].mxu0  ;;  %v342_v48 = vadd.f32 %v384_v42, %v341_v46 }
 0x2bd   :  { %347 = vmax.xlane.f32.xlu0 %v342_v48 }
 0x346   :  { %v346_v49 = vpop.xlane.xlu0 %345 }
 0x347   :  { %v349_v51 = vsub.f32 %v339_v44, %v346_v49 }
 0x34a   :  { %v348_v50 = vpop.xlane.xlu0 %347 }
 0x34b   :  { %v350_v52 = vsub.f32 %v342_v48, %v348_v50 }
 0x34d   :  { %v351_v53 = vpack.c.bf16 %v350_v52, %v349_v51 }
 0x34f   :  { %v353_v54 = vmul.bf16 1069105081, %v351_v53 }
 0x351   :  { %481 = vpow.bf16 %v353_v54 }
 0x35c   :  { %v482_v55 = vpop.eup %481 }
 0x35d   :  { %v355_v56 = vunpack.c.l.bf16 %v482_v55  ;;  %v356_v57 = vunpack.c.h.bf16 %v482_v55 }
 0x35f   :  { %357 = vadd.xlane.f32.xlu1 %v355_v56 }
 0x363   :  { %359 = vadd.xlane.f32.xlu1 %v356_v57 }
 0x3ec   :  { %v358_v58 = vpop.xlane.xlu1 %357 }
 0x3ed   :  { %483 = vrcp.f32 %v358_v58 }
 0x3f0   :  { %v360_v59 = vpop.xlane.xlu1 %359 }
 0x3f1   :  { %485 = vrcp.f32 %v360_v59 }
 0x3f7   :  { %v484_v60 = vpop.eup %483 }
 0x3f8   :  { %v362_v61 = vmul.f32 %v484_v60, %v355_v56 }
 0x3fa   :  { %365 = vst [vmem:[%s659_s7] sm:$0xff] %v362_v61 }
 0x3fb   :  { %v486_v62 = vpop.eup %485 }
 0x3fc   :  { %v364_v63 = vmul.f32 %v486_v62, %v356_v57 }
 0x3fe   :  { %366 = vst [vmem:[%s659_s7 + $0x8] sm:$0xff] %v364_v63 }
 0x3ff   :  { %371 = vsyncpa [#allocation3], 1 }
 0x400   :  { %372 = vsyncpa [#allocation5], 1 }

</bundles_post_ra>
